<compile_context>
chip_gen: v6e
topology: v6e:2x2x1
jax: 0.10.0
libtpu: 0.0.40
codegen_flags: <defaults>
</compile_context>

<pallas_src>
import jax
import jax.numpy as jnp
from jax.experimental import pallas as pl
from jax.experimental.pallas import tpu as pltpu


def _round_up(x, m):
    return ((x + m - 1) // m) * m


def _tpu_generation():
    """Best-effort TPU generation detection (4/5/6/7); defaults to 6."""
    try:
        kind = jax.devices()[0].device_kind.lower()
    except Exception:
        return 6
    for gen in (7, 6, 5, 4):
        if (f"v{gen}" in kind) or (f"tpu{gen}" in kind):
            return gen
    return 6


# ----------------------------------------------------------------------------
# Kernels
# ----------------------------------------------------------------------------
def _svm_linear_kernel_resident(x_ref, w_ref, b_ref, o_ref):
    # Whole (D_pad, C_pad) weight resident in VMEM; one dot + bias per M tile.
    o_ref[...] = (
        jnp.dot(x_ref[...], w_ref[...], preferred_element_type=jnp.float32)
        + b_ref[...].astype(jnp.float32)
    ).astype(o_ref.dtype)


def _svm_linear_kernel_tiled(x_ref, wt_ref, b_ref, o_ref, acc_ref):
    # Large-weight fallback: f32 accumulator resident across K; bias folded
    # into the k == 0 init (no zero-fill pass, no finalize add).
    k = pl.program_id(2)
    prod = jnp.dot(x_ref[...], wt_ref[...], preferred_element_type=jnp.float32)

    @pl.when(k == 0)
    def _():
        acc_ref[...] = prod + b_ref[...].astype(jnp.float32)

    @pl.when(k != 0)
    def _():
        acc_ref[...] += prod

    @pl.when(k == pl.num_programs(2) - 1)
    def _():
        o_ref[...] = acc_ref[...].astype(o_ref.dtype)


# ----------------------------------------------------------------------------
# One-time (init-time) parameter prep
# ----------------------------------------------------------------------------
def prepare_svm_params(weight, bias, *, compute_dtype=jnp.bfloat16,
                       lane_multiple=None):
    """weight: (C, D) nn.Linear layout; bias: (C,).

    Returns wt_pad: (D_pad, C_pad) in compute_dtype, b_pad: (1, C_pad) f32.
    Padding multiple is generation-aware (256 on v6e/v7x, 128 on v5e) and the
    extra rows/cols are zero so padded logits are inert.
    """
    C, D = weight.shape
    if lane_multiple is None:
        lane_multiple = 128 if _tpu_generation() <= 5 else 256
    D_pad = _round_up(D, lane_multiple)
    C_pad = _round_up(C, lane_multiple)
    wt_pad = jnp.zeros((D_pad, C_pad), dtype=compute_dtype)
    wt_pad = wt_pad.at[:D, :C].set(weight.T.astype(compute_dtype))
    b_pad = jnp.zeros((1, C_pad), dtype=jnp.float32)
    b_pad = b_pad.at[0, :C].set(bias.astype(jnp.float32))
    return wt_pad, b_pad


# ----------------------------------------------------------------------------
# Forward
# ----------------------------------------------------------------------------
_RESIDENT_WEIGHT_BYTES = 8 * 1024 * 1024  # keep whole weight in VMEM below this


def multiclass_svm_forward(x, wt_pad, b_pad, num_classes, *,
                           out_dtype=jnp.float32):
    """x: (B, D); wt_pad: (D_pad, C_pad); b_pad: (1, C_pad) -> (B, num_classes)."""
    B, D = x.shape
    D_pad, C_pad = wt_pad.shape
    assert D <= D_pad and num_classes <= C_pad

    compute_dtype = wt_pad.dtype
    in_it = jnp.dtype(compute_dtype).itemsize
    out_it = jnp.dtype(out_dtype).itemsize

    gen = _tpu_generation()
    vmem_limit = (48 if gen >= 7 else 64) * 1024 * 1024
    budget = int(vmem_limit * 0.75)

    w_bytes = D_pad * C_pad * in_it
    resident = w_bytes <= _RESIDENT_WEIGHT_BYTES

    # ---- batch tile ----
    tm_cap = 1024 if gen <= 5 else 512  # v5e: fewer, bigger DMAs
    tm = min(tm_cap, _round_up(B, 8))
    B_pad = _round_up(B, tm)

    if resident:
        # v7x: make sure the single parallel grid axis has >= 2 tiles when the
        # batch is big enough, so both TensorCores get work.
        if gen >= 7 and B_pad // tm < 2 and B_pad >= 16:
            tm = max(8, _round_up((B_pad + 1) // 2, 8))
            B_pad = _round_up(B, tm)

        # Shrink tm until double-buffered x/out tiles + (double-buffered)
        # resident weight + bias fit the VMEM budget.
        def _vmem_need(t):
            return (2 * t * D_pad * in_it + 2 * t * C_pad * out_it
                    + 2 * w_bytes + 2 * C_pad * 4)

        while tm > 8 and _vmem_need(tm) > budget:
            tm = max(8, (tm // 2) // 8 * 8)
        B_pad = _round_up(B, tm)

    # ---- activations: cast / pad only when actually needed ----
    if x.dtype != compute_dtype:
        x = x.astype(compute_dtype)
    pad_b, pad_d = B_pad - B, D_pad - D
    if pad_b or pad_d:
        # TODO(synk): for zero-copy, produce activations already D_pad-wide upstream.
        x = jnp.pad(x, ((0, pad_b), (0, pad_d)))

    if resident:
        m_tiles = B_pad // tm
        cost = pl.CostEstimate(
            flops=2 * B_pad * D_pad * C_pad,
            transcendentals=0,
            bytes_accessed=(B_pad * D_pad * in_it      # x streamed once
                            + w_bytes                   # weight DMA'd once
                            + 4 * C_pad
                            + B_pad * C_pad * out_it),
        )
        out_pad = pl.pallas_call(
            _svm_linear_kernel_resident,
            out_shape=jax.ShapeDtypeStruct((B_pad, C_pad), out_dtype),
            grid_spec=pltpu.PrefetchScalarGridSpec(
                num_scalar_prefetch=0,
                grid=(m_tiles,),
                in_specs=[
                    pl.BlockSpec((tm, D_pad), lambda i: (i, 0)),
                    pl.BlockSpec((D_pad, C_pad), lambda i: (0, 0)),  # resident weight
                    pl.BlockSpec((1, C_pad), lambda i: (0, 0)),
                ],
                out_specs=pl.BlockSpec((tm, C_pad), lambda i: (i, 0)),
            ),
            compiler_params=pltpu.CompilerParams(
                dimension_semantics=("parallel",),
                vmem_limit_bytes=vmem_limit,
            ),
            cost_estimate=cost,
        )(x, wt_pad, b_pad)
    else:
        # ---- large-weight fallback: stream weight tiles, K reduction last ----
        tile_cands = (512, 256, 128)
        tn = next((c for c in tile_cands if C_pad % c == 0), C_pad)
        tk = next((c for c in tile_cands if D_pad % c == 0), D_pad)
        if gen >= 7 and (B_pad // tm) * (C_pad // tn) < 2 and B_pad >= 16:
            tm = max(8, _round_up((B_pad + 1) // 2, 8))
            B_pad = _round_up(B, tm)
            if B_pad > x.shape[0]:
                x = jnp.pad(x, ((0, B_pad - x.shape[0]), (0, 0)))
        m_tiles, n_tiles, k_tiles = B_pad // tm, C_pad // tn, D_pad // tk
        cost = pl.CostEstimate(
            flops=2 * B_pad * D_pad * C_pad,
            transcendentals=0,
            bytes_accessed=(n_tiles * B_pad * D_pad * in_it   # x re-streamed per N tile
                            + m_tiles * w_bytes               # weight re-streamed per M tile
                            + 4 * C_pad
                            + B_pad * C_pad * out_it),
        )
        out_pad = pl.pallas_call(
            _svm_linear_kernel_tiled,
            out_shape=jax.ShapeDtypeStruct((B_pad, C_pad), out_dtype),
            grid_spec=pltpu.PrefetchScalarGridSpec(
                num_scalar_prefetch=0,
                grid=(m_tiles, n_tiles, k_tiles),
                in_specs=[
                    pl.BlockSpec((tm, tk), lambda i, j, k: (i, k)),
                    pl.BlockSpec((tk, tn), lambda i, j, k: (k, j)),
                    pl.BlockSpec((1, tn), lambda i, j, k: (0, j)),
                ],
                out_specs=pl.BlockSpec((tm, tn), lambda i, j, k: (i, j)),
                scratch_shapes=[pltpu.VMEM((tm, tn), jnp.float32)],
            ),
            compiler_params=pltpu.CompilerParams(
                dimension_semantics=("parallel", "parallel", "arbitrary"),
                vmem_limit_bytes=vmem_limit,
            ),
            cost_estimate=cost,
        )(x, wt_pad, b_pad)

    return out_pad[:B, :num_classes]


if __name__ == "__main__":
    # Small shapes consistent with the module: batch=8, input_dim=32, num_classes=10
    B, D, C = 8, 32, 10
    key = jax.random.PRNGKey(0)
    kx, kw, kb = jax.random.split(key, 3)

    x = jax.random.normal(kx, (B, D), dtype=jnp.float32)

    # Deterministic nn.Linear-style init: U(-1/sqrt(D), 1/sqrt(D))
    bound = 1.0 / jnp.sqrt(jnp.float32(D))
    weight = jax.random.uniform(kw, (C, D), minval=-bound, maxval=bound,
                                dtype=jnp.float32)
    bias = jax.random.uniform(kb, (C,), minval=-bound, maxval=bound,
                              dtype=jnp.float32)

    # Param prep happens once (init time), not per forward call. Production use
    # on v6e/v7x would keep the bf16 default (or fp8 on v7x / int8 on v5e/v6e);
    # f32 here so the demo's numeric check stays tight.
    wt_pad, b_pad = prepare_svm_params(weight, bias, compute_dtype=jnp.float32)

    out = multiclass_svm_forward(x, wt_pad, b_pad, C, out_dtype=jnp.float32)
    out = jax.block_until_ready(out)

    # Reference check against plain JAX linear.
    ref = x @ weight.T + bias
    assert out.shape == (B, C)
    assert jnp.allclose(out, ref, atol=1e-5, rtol=1e-5)

    # TODO(synk): hinge_loss is a training-time loss method, not part of forward();
    # not implemented as a kernel.
    print("KERNEL_OK")
</pallas_src>

<mosaic_0001>
module attributes {stable_mosaic.version = 11 : i64} {
  func.func @_svm_linear_kernel_resident(%arg0: i32, %arg1: memref<8x256xf32, #tpu.memory_space<vmem>>, %arg2: memref<256x256xf32, #tpu.memory_space<vmem>>, %arg3: memref<1x256xf32, #tpu.memory_space<vmem>>, %arg4: memref<8x256xf32, #tpu.memory_space<vmem>>) attributes {dimension_semantics = [#tpu.dimension_semantics<parallel>], iteration_bounds = array<i64: 1>, scalar_prefetch = 0 : i64, scratch_operands = 0 : i64, tpu.core_type = #tpu.core_type<tc>, window_params = [{transform_indices = @transform_0, window_bounds = array<i64: 8, 256>}, {pipeline_mode = #tpu.pipeline_mode<synchronous>, transform_indices = @transform_1, window_bounds = array<i64: 256, 256>}, {pipeline_mode = #tpu.pipeline_mode<synchronous>, transform_indices = @transform_2, window_bounds = array<i64: 1, 256>}, {transform_indices = @transform_3, window_bounds = array<i64: 8, 256>}]} {
    %c0 = arith.constant 0 : index
    %c0_0 = arith.constant 0 : index
    %0 = vector.load %arg1[%c0, %c0_0] : memref<8x256xf32, #tpu.memory_space<vmem>>, vector<8x256xf32>
    %c0_1 = arith.constant 0 : index
    %c0_2 = arith.constant 0 : index
    %1 = vector.load %arg2[%c0_1, %c0_2] : memref<256x256xf32, #tpu.memory_space<vmem>>, vector<256x256xf32>
    %cst = arith.constant dense<0.000000e+00> : vector<8x256xf32>
    %2 = tpu.matmul %0, %1, %cst {dimension_numbers = #tpu.dot_dimension_numbers<[1], [0], [0], [1], [0, 0, 1, 1], [], []>} : vector<8x256xf32>, vector<256x256xf32>, vector<8x256xf32> -> vector<8x256xf32>
    %c0_3 = arith.constant 0 : index
    %c0_4 = arith.constant 0 : index
    %3 = vector.load %arg3[%c0_3, %c0_4] : memref<1x256xf32, #tpu.memory_space<vmem>>, vector<1x256xf32>
    %4 = vector.broadcast %3 : vector<1x256xf32> to vector<8x256xf32>
    %5 = arith.addf %2, %4 : vector<8x256xf32>
    %c0_5 = arith.constant 0 : index
    %c0_6 = arith.constant 0 : index
    %6 = vector.load %arg4[%c0_5, %c0_6] : memref<8x256xf32, #tpu.memory_space<vmem>>, vector<8x256xf32>
    tpu.vector_store %arg4[%c0_5, %c0_6], %5 {strides = array<i32>} : memref<8x256xf32, #tpu.memory_space<vmem>>, vector<8x256xf32>,
    return
  }
  func.func @transform_0(%arg0: i32) -> (i32, i32) {
    %c0_i32 = arith.constant 0 : i32
    %c0_i32_0 = arith.constant 0 : i32
    return %arg0, %c0_i32 : i32, i32
  }
  func.func @transform_1(%arg0: i32) -> (i32, i32) {
    %c0_i32 = arith.constant 0 : i32
    %c0_i32_0 = arith.constant 0 : i32
    %c0_i32_1 = arith.constant 0 : i32
    return %c0_i32, %c0_i32_0 : i32, i32
  }
  func.func @transform_2(%arg0: i32) -> (i32, i32) {
    %c0_i32 = arith.constant 0 : i32
    %c0_i32_0 = arith.constant 0 : i32
    %c0_i32_1 = arith.constant 0 : i32
    return %c0_i32, %c0_i32_0 : i32, i32
  }
  func.func @transform_3(%arg0: i32) -> (i32, i32) {
    %c0_i32 = arith.constant 0 : i32
    %c0_i32_0 = arith.constant 0 : i32
    return %arg0, %c0_i32 : i32, i32
  }
}

</mosaic_0001>

<bundles_post_ra>
// kernel: tpu_custom_call.1
= control target key start
LH: loop header
LB: loop body
LE: loop exit
PB: predicated region body
PF: predicated region fallthrough
CT: control target
= control target key end

     0   :  { %8 = vsyncpa [#allocation3], 0  ;;  %s316_s0 = inlined_call_operand.hbm [shape: f32[8,256], index: 0, kind: input, shape index: {}]   ;;  %s317_s1 = inlined_call_operand.hbm [shape: f32[256,256], index: 1, kind: input, shape index: {}]   ;;  %s318_s2 = inlined_call_operand.vmem [shape: f32[1,256], index: 2, kind: input, shape index: {}]   ;;  %s319_s3 = inlined_call_operand.hbm [shape: f32[8,256], index: 3, kind: output, shape index: {}]  }
   0x1   :  { %9 = vsyncpa [#allocation6], 0 }
   0x2   :  { %10 = vsyncpa [#allocation4], 0  ;;  %s279_s12 = smov [#allocation2]   ;;  %s280_s14 = smov [#allocation5]  }
   0x3   :  { %s17_s13 = sshll.u32 %s279_s12, 4  ;;  %s26_s15 = sshll.u32 %s280_s14, 4  ;;  %s18_s13 = int_to_ptr.vmem [resolvable:$true] %s17_s13  ;;  %s27_s15 = int_to_ptr.vmem [resolvable:$true] %s26_s15 }
   0x4   :  { %s221_s16 = scalar_lea.vmem %s18_s13, 256  ;;  %p226_p1 = scmp.lt.s32.totalorder %s18_s13, %s18_s13 }
   0x5   :  { %p222_p0 = scmp.ne.s32.totalorder %s18_s13, %s221_s16  ;;  %p227_p2 = scmp.lt.s32.totalorder %s221_s16, %s221_s16 }
   0x7   :  { %p228_p3 = por %p227_p2, %p226_p1 }
   0x9   :  { %p229_p4 = pnand %p228_p3, %p222_p0 }
   0xb   :  { %232 = shalt.err (!%p229_p4)
}
   0xc   :  { %20 = dma.hbm_to_vmem [thread:$0]  %s316_s0, 256, %s18_s13, [#allocation3]  }
   0xd   :  { %s241_s19 = scalar_lea.vmem %s27_s15, 8192  ;;  %p246_p6 = scmp.lt.s32.totalorder %s27_s15, %s27_s15 }
   0xe   :  { %p242_p5 = scmp.ne.s32.totalorder %s27_s15, %s241_s19  ;;  %p247_p7 = scmp.lt.s32.totalorder %s241_s19, %s241_s19 }
  0x10   :  { %p248_p8 = por %p247_p7, %p246_p6 }
  0x12   :  { %p249_p9 = pnand %p248_p8, %p242_p5 }
  0x14   :  { %252 = shalt.err (!%p249_p9)
}
  0x15   :  { %s281_s20 = smov 256   ;;  %s282_s21 = smov 16  }
  0x16   :  { %32 = dma.hbm_to_vmem [thread:$0]  %s317_s1, 8192, %s27_s15, [#allocation6], %s281_s20, %s281_s20, %s282_s21  }
  0x17   :  { %273 = dma.done.wait [#allocation3], 256  }
  0x18   :  { %274 = vsyncadd [#allocation3], 4294967040 }
  0x19   :  { %275 = dma.done.wait [#allocation6], 8192  }
  0x1a   :  { %276 = vsyncadd [#allocation6], 4294959104  ;;  %v74_v0 = vld [vmem:[#allocation5 + $0xf8] sm:$0xff]  ;;  %v73_v1 = vld [vmem:[#allocation5 + $0xf0] sm:$0xff]  ;;  %s283_s24 = smov [#allocation7]  }
  0x1b   :  { %v72_v2 = vld [vmem:[#allocation5 + $0xe8] sm:$0xff]  ;;  %119 = vmatprep.subr.mxu0 %v74_v0  ;;  %v71_v3 = vld [vmem:[#allocation5 + $0xe0] sm:$0xff]  ;;  %v70_v4 = vld [vmem:[#allocation5 + $0xd8] sm:$0xff]  ;;  %s198_s25 = sshll.u32 %s283_s24, 4  ;;  %s199_s25 = int_to_ptr.vmem [resolvable:$true] %s198_s25 }
  0x1c   :  { %120 = vmatpush1.msra.mxu0 %v73_v1  ;;  %v69_v5 = vld [vmem:[#allocation5 + $0xd0] sm:$0xff]  ;;  %v68_v6 = vld [vmem:[#allocation5 + $0xc8] sm:$0xff]  ;;  %v67_v7 = vld [vmem:[#allocation5 + $0xc0] sm:$0xff]  ;;  %s253_s26 = scalar_lea.vmem %s199_s25, 256  ;;  %p258_p11 = scmp.lt.s32.totalorder %s199_s25, %s199_s25 }
  0x1d   :  { %121 = vmatprep.subr.mxu0 %v72_v2  ;;  %v66_v8 = vld [vmem:[#allocation5 + $0xb8] sm:$0xff]  ;;  %v65_v9 = vld [vmem:[#allocation5 + $0xb0] sm:$0xff]  ;;  %v64_v10 = vld [vmem:[#allocation5 + $0xa8] sm:$0xff]  ;;  %v109_v2 = vlaneseq  ;;  %p254_p10 = scmp.ne.s32.totalorder %s199_s25, %s253_s26  ;;  %p259_p12 = scmp.lt.s32.totalorder %s253_s26, %s253_s26 }
  0x1e   :  { %122 = vmatpush1.msra.mxu0 %v71_v3  ;;  %v63_v11 = vld [vmem:[#allocation5 + $0xa0] sm:$0xff]  ;;  %v62_v12 = vld [vmem:[#allocation5 + $0x98] sm:$0xff]  ;;  %v61_v13 = vld [vmem:[#allocation5 + $0x90] sm:$0xff] }
  0x1f   :  { %123 = vmatprep.subr.mxu0 %v70_v4  ;;  %v60_v14 = vld [vmem:[#allocation5 + $0x88] sm:$0xff]  ;;  %v59_v15 = vld [vmem:[#allocation5 + $0x80] sm:$0xff]  ;;  %v58_v16 = vld [vmem:[#allocation5 + $0x78] sm:$0xff]  ;;  %v110_v3 = vshrl.u32 %v109_v2, 7  ;;  %p260_p13 = por %p259_p12, %p258_p11 }
  0x20   :  { %124 = vmatpush1.msra.mxu0 %v69_v5  ;;  %v57_v17 = vld [vmem:[#allocation5 + $0x70] sm:$0xff]  ;;  %v56_v18 = vld [vmem:[#allocation5 + $0x68] sm:$0xff]  ;;  %v55_v19 = vld [vmem:[#allocation5 + $0x60] sm:$0xff] }
  0x21   :  { %125 = vmatprep.subr.mxu0 %v68_v6  ;;  %v54_v20 = vld [vmem:[#allocation5 + $0x58] sm:$0xff]  ;;  %v53_v21 = vld [vmem:[#allocation5 + $0x50] sm:$0xff]  ;;  %v52_v22 = vld [vmem:[#allocation5 + $0x48] sm:$0xff]  ;;  %v111_v4 = vsub.s32 0, %v110_v3  ;;  %v115_v6 = vsub.s32 1, %v110_v3  ;;  %p261_p0 = pnand %p260_p13, %p254_p10 }
  0x22   :  { %126 = vmatpush1.msra.mxu0 %v67_v7  ;;  %v51_v23 = vld [vmem:[#allocation5 + $0x40] sm:$0xff]  ;;  %v42_v24 = vld [vmem:[#allocation2 + $0x8] sm:$0xff]  ;;  %v49_v26 = vld [vmem:[#allocation5 + $0x30] sm:$0xff] }
  0x23   :  { %127 = vmatprep.subr.mxu0 %v66_v8  ;;  %v50_v25 = vld [vmem:[#allocation5 + $0x38] sm:$0xff]  ;;  %183 = vmatprep.mubr.f32.mxu0 %v42_v24  ;;  %v48_v27 = vld [vmem:[#allocation5 + $0x28] sm:$0xff]  ;;  %v47_v28 = vld [vmem:[#allocation5 + $0x20] sm:$0xff] }
  0x24   :  { %128 = vmatpush1.msra.mxu0 %v65_v9  ;;  %v46_v29 = vld [vmem:[#allocation5 + $0x18] sm:$0xff]  ;;  %v45_v30 = vld [vmem:[#allocation5 + $0x10] sm:$0xff]  ;;  %v44_v31 = vld [vmem:[#allocation5 + $0x8] sm:$0xff] }
  0x25   :  { %129 = vmatprep.subr.mxu0 %v64_v10  ;;  %v43_v32 = vld [vmem:[#allocation5] sm:$0xff]  ;;  %v106_v33 = vld [vmem:[#allocation5 + $0x1f8] sm:$0xff]  ;;  %v105_v34 = vld [vmem:[#allocation5 + $0x1f0] sm:$0xff] }
  0x26   :  { %130 = vmatpush1.msra.mxu0 %v63_v11  ;;  %v104_v35 = vld [vmem:[#allocation5 + $0x1e8] sm:$0xff]  ;;  %v103_v36 = vld [vmem:[#allocation5 + $0x1e0] sm:$0xff]  ;;  %v102_v37 = vld [vmem:[#allocation5 + $0x1d8] sm:$0xff] }
  0x27   :  { %131 = vmatprep.subr.mxu0 %v62_v12  ;;  %v101_v38 = vld [vmem:[#allocation5 + $0x1d0] sm:$0xff]  ;;  %v100_v39 = vld [vmem:[#allocation5 + $0x1c8] sm:$0xff]  ;;  %v99_v40 = vld [vmem:[#allocation5 + $0x1c0] sm:$0xff] }
  0x28   :  { %132 = vmatpush1.msra.mxu0 %v61_v13  ;;  %v98_v41 = vld [vmem:[#allocation5 + $0x1b8] sm:$0xff]  ;;  %v97_v42 = vld [vmem:[#allocation5 + $0x1b0] sm:$0xff]  ;;  %v96_v43 = vld [vmem:[#allocation5 + $0x1a8] sm:$0xff] }
  0x29   :  { %133 = vmatprep.subr.mxu0 %v60_v14  ;;  %v95_v44 = vld [vmem:[#allocation5 + $0x1a0] sm:$0xff]  ;;  %v94_v45 = vld [vmem:[#allocation5 + $0x198] sm:$0xff]  ;;  %v93_v46 = vld [vmem:[#allocation5 + $0x190] sm:$0xff] }
  0x2a   :  { %134 = vmatpush1.msra.mxu0 %v59_v15  ;;  %v92_v47 = vld [vmem:[#allocation5 + $0x188] sm:$0xff]  ;;  %v91_v48 = vld [vmem:[#allocation5 + $0x180] sm:$0xff]  ;;  %v90_v49 = vld [vmem:[#allocation5 + $0x178] sm:$0xff] }
  0x2b   :  { %135 = vmatprep.subr.mxu0 %v58_v16  ;;  %v89_v50 = vld [vmem:[#allocation5 + $0x170] sm:$0xff]  ;;  %v88_v51 = vld [vmem:[#allocation5 + $0x168] sm:$0xff]  ;;  %v87_v52 = vld [vmem:[#allocation5 + $0x160] sm:$0xff] }
  0x2c   :  { %136 = vmatpush1.msra.mxu0 %v57_v17  ;;  %v86_v53 = vld [vmem:[#allocation5 + $0x158] sm:$0xff]  ;;  %v85_v54 = vld [vmem:[#allocation5 + $0x150] sm:$0xff]  ;;  %v84_v55 = vld [vmem:[#allocation5 + $0x148] sm:$0xff] }
  0x2d   :  { %137 = vmatprep.subr.mxu0 %v56_v18  ;;  %v83_v56 = vld [vmem:[#allocation5 + $0x140] sm:$0xff]  ;;  %v82_v57 = vld [vmem:[#allocation5 + $0x138] sm:$0xff]  ;;  %v81_v58 = vld [vmem:[#allocation5 + $0x130] sm:$0xff] }
  0x2e   :  { %138 = vmatpush1.msra.mxu0 %v55_v19  ;;  %v80_v59 = vld [vmem:[#allocation5 + $0x128] sm:$0xff]  ;;  %v79_v60 = vld [vmem:[#allocation5 + $0x120] sm:$0xff]  ;;  %v78_v61 = vld [vmem:[#allocation5 + $0x118] sm:$0xff] }
  0x2f   :  { %139 = vmatprep.subr.mxu0 %v54_v20  ;;  %v77_v62 = vld [vmem:[#allocation5 + $0x110] sm:$0xff]  ;;  %v76_v63 = vld [vmem:[#allocation5 + $0x108] sm:$0xff]  ;;  %v75_v0 = vld [vmem:[#allocation5 + $0x100] sm:$0xff] }
  0x30   :  { %140 = vmatpush1.msra.mxu0 %v53_v21  ;;  %v41_v1 = vld [vmem:[#allocation2] sm:$0xff] }
  0x31   :  { %141 = vmatprep.subr.mxu0 %v52_v22  ;;  %v107_v5 = vld [vmem:[%s318_s2] sm:$0x3] }
  0x32   :  { %142 = vmatpush1.msra.mxu0 %v51_v23  ;;  %v112_v7 = vrot.slane %v107_v5, %v111_v4  ;;  %v116_v8 = vrot.slane %v107_v5, %v115_v6 }
  0x33   :  { %143 = vmatprep.subr.mxu0 %v50_v25 }
  0x34   :  { %144 = vmatpush1.msra.mxu0 %v49_v26 }
  0x35   :  { %145 = vmatprep.subr.mxu0 %v48_v27 }
  0x36   :  { %146 = vmatpush1.msra.mxu0 %v47_v28 }
  0x37   :  { %147 = vmatprep.subr.mxu0 %v46_v29 }
  0x38   :  { %148 = vmatpush1.msra.mxu0 %v45_v30 }
  0x39   :  { %149 = vmatprep.subr.mxu0 %v44_v31 }
  0x3a   :  { %150 = vmatpush1.msra.mxu0 %v43_v32 }
  0x3b   :  { %151 = vmatprep.subr.mxu0 %v106_v33 }
  0x3c   :  { %152 = vmatpush2.msra.mxu0 %v105_v34 }
  0x3d   :  { %153 = vmatprep.subr.mxu0 %v104_v35 }
  0x3e   :  { %154 = vmatpush2.msra.mxu0 %v103_v36 }
  0x3f   :  { %155 = vmatprep.subr.mxu0 %v102_v37 }
  0x40   :  { %156 = vmatpush2.msra.mxu0 %v101_v38 }
  0x41   :  { %157 = vmatprep.subr.mxu0 %v100_v39 }
  0x42   :  { %158 = vmatpush2.msra.mxu0 %v99_v40 }
  0x43   :  { %159 = vmatprep.subr.mxu0 %v98_v41 }
  0x44   :  { %160 = vmatpush2.msra.mxu0 %v97_v42 }
  0x45   :  { %161 = vmatprep.subr.mxu0 %v96_v43 }
  0x46   :  { %162 = vmatpush2.msra.mxu0 %v95_v44 }
  0x47   :  { %163 = vmatprep.subr.mxu0 %v94_v45 }
  0x48   :  { %164 = vmatpush2.msra.mxu0 %v93_v46 }
  0x49   :  { %165 = vmatprep.subr.mxu0 %v92_v47 }
  0x4a   :  { %166 = vmatpush2.msra.mxu0 %v91_v48 }
  0x4b   :  { %167 = vmatprep.subr.mxu0 %v90_v49 }
  0x4c   :  { %168 = vmatpush2.msra.mxu0 %v89_v50 }
  0x4d   :  { %169 = vmatprep.subr.mxu0 %v88_v51 }
  0x4e   :  { %170 = vmatpush2.msra.mxu0 %v87_v52 }
  0x4f   :  { %171 = vmatprep.subr.mxu0 %v86_v53 }
  0x50   :  { %172 = vmatpush2.msra.mxu0 %v85_v54 }
  0x51   :  { %173 = vmatprep.subr.mxu0 %v84_v55 }
  0x52   :  { %174 = vmatpush2.msra.mxu0 %v83_v56 }
  0x53   :  { %175 = vmatprep.subr.mxu0 %v82_v57 }
  0x54   :  { %176 = vmatpush2.msra.mxu0 %v81_v58 }
  0x55   :  { %177 = vmatprep.subr.mxu0 %v80_v59 }
  0x56   :  { %178 = vmatpush2.msra.mxu0 %v79_v60 }
  0x57   :  { %179 = vmatprep.subr.mxu0 %v78_v61 }
  0x58   :  { %180 = vmatpush2.msra.mxu0 %v77_v62 }
  0x59   :  { %181 = vmatprep.subr.mxu0 %v76_v63 }
  0x5a   :  { %182 = vmatpush2.msra.mxu0 %v75_v0 }
  0x5b   :  { %184 = vmatmul.mubr.f32.vlgmr.msra.gmra.mxu0 %v41_v1 }
 0x11b   :  { %v185_v9 = vpop.f32.mrf.mxu0 }
 0x11c   :  { %v186_v10 = vadd.f32 %v185_v9, %v112_v7 }
 0x11d   :  { %v187_v11 = vpop.f32.mrf.mxu0 }
 0x11e   :  { %190 = vst [vmem:[#allocation7] sm:$0xff] %v186_v10  ;;  %v188_v12 = vadd.f32 %v187_v11, %v116_v8 }
 0x120   :  { %191 = vst [vmem:[#allocation7 + $0x8] sm:$0xff] %v188_v12 }
 0x121   :  { %264 = shalt.err (!%p261_p0)
}
 0x122   :  { %201 = dma.vmem_to_hbm [thread:$0]  %s199_s25, 256, %s319_s3, [#allocation4]  }
 0x123   :  { %277 = dma.done.wait [#allocation4], 256  }
 0x124   :  { %278 = vsyncadd [#allocation4], 4294967040 }
 0x125   :  { %205 = vsyncpa [#allocation3], 1 }
 0x126   :  { %206 = vsyncpa [#allocation6], 1 }
 0x127   :  { %207 = vsyncpa [#allocation4], 1 }

</bundles_post_ra>
